<compile_context>
chip_gen: v7x
topology: tpu7x:2x2x1
jax: 0.10.0
libtpu: 0.0.40
codegen_flags: <defaults>
</compile_context>

<pallas_src>
import functools

import jax
import jax.numpy as jnp
from jax.experimental import pallas as pl
from jax.experimental.pallas import tpu as pltpu


# ----------------------------------------------------------------------------
# Tiling helpers
# ----------------------------------------------------------------------------
def _round_up(x, m):
    return (x + m - 1) // m * m


def _balanced_tile(dim, cap, align):
    """Largest aligned tile <= cap that minimizes padding of `dim`."""
    dim = max(int(dim), 1)
    if dim <= cap:
        return _round_up(dim, align)
    n_tiles = -(-dim // cap)
    return _round_up(-(-dim // n_tiles), align)


def _vmem_limit_bytes():
    # Per-generation scoped-VMEM budget: ~3/4 of physical capacity,
    # capped at 96 MiB (v5e/v6e: 128 MiB, v7x: 64 MiB per TensorCore).
    try:
        info = pltpu.get_tpu_info()
        cap = int(getattr(info, "vmem_capacity_bytes", 64 * 1024 * 1024))
    except Exception:
        cap = 64 * 1024 * 1024
    return min(cap * 3 // 4, 96 * 1024 * 1024)


def _compiler_params(vmem_limit):
    return pltpu.CompilerParams(
        dimension_semantics=("parallel", "arbitrary", "arbitrary"),
        vmem_limit_bytes=int(vmem_limit),
    )


# ----------------------------------------------------------------------------
# Kernel 1: fused  logits = hidden @ W  +  per-example cross-entropy NLL
# ----------------------------------------------------------------------------
def _fused_kernel(labels_ref, h_ref, w_ref,          # inputs
                  logits_ref, nll_ref,               # outputs
                  m_ref, l_ref, p_ref,               # scratch
                  *, num_labels, tn, mask_pad):
    li = pl.program_id(1)
    ki = pl.program_id(2)
    nl = pl.num_programs(1)
    nk = pl.num_programs(2)

    # The logits output block index is constant across ki, so it stays
    # resident in VMEM and is used directly as the f32 matmul accumulator.
    @pl.when(ki == 0)
    def _():
        logits_ref[...] = jnp.zeros_like(logits_ref)

    @pl.when((li == 0) & (ki == 0))
    def _():
        m_ref[...] = jnp.full(m_ref.shape, -jnp.inf, dtype=jnp.float32)
        l_ref[...] = jnp.zeros(l_ref.shape, dtype=jnp.float32)
        p_ref[...] = jnp.zeros(p_ref.shape, dtype=jnp.float32)

    logits_ref[...] += jnp.dot(h_ref[...], w_ref[...],
                               preferred_element_type=jnp.float32)

    # Epilogue for this (batch, label) tile: online logsumexp + label pick.
    @pl.when(ki == nk - 1)
    def _():
        logits = logits_ref[...]                                   # (tm, tn) f32

        # Global column index of each lane in this label-tile window
        # (needed for the label pick regardless of padding).
        cols = li * tn + jax.lax.broadcasted_iota(jnp.int32, logits.shape, 1)

        if mask_pad:
            # Only present when label_num is not a multiple of tn; padded
            # columns must not contribute to the softmax normalizer.
            masked = jnp.where(cols < num_labels, logits, -jnp.inf)
        else:
            masked = logits

        # Online (flash-style) logsumexp update.
        m_prev = m_ref[...]                                        # (tm, 1)
        m_new = jnp.maximum(m_prev, jnp.max(masked, axis=-1, keepdims=True))
        l_ref[...] = jnp.exp(m_prev - m_new) * l_ref[...] + jnp.sum(
            jnp.exp(masked - m_new), axis=-1, keepdims=True)
        m_ref[...] = m_new

        # Pick logits[i, label[i]] if the label falls inside this window
        # (exactly one window contains a valid label; negative labels never hit).
        labels = labels_ref[...]                                   # (tm, 1) int32
        p_ref[...] += jnp.sum(jnp.where(cols == labels, logits, 0.0),
                              axis=-1, keepdims=True)

    # Finalize per-example NLL once all label tiles have been folded in.
    @pl.when((li == nl - 1) & (ki == nk - 1))
    def _():
        nll_ref[...] = (m_ref[...] + jnp.log(l_ref[...])) - p_ref[...]


@functools.partial(
    jax.jit,
    static_argnames=("num_labels", "tm", "tk", "tn", "compute_dtype_name",
                     "vmem_limit"))
def _forward_with_loss(hidden, weight_p, labels, *, num_labels, tm, tk, tn,
                       compute_dtype_name, vmem_limit):
    B, H = hidden.shape
    Hp, Lp = weight_p.shape
    dtype = jnp.dtype(compute_dtype_name)

    Bp = _round_up(B, tm)
    h = jnp.pad(hidden, ((0, Bp - B), (0, Hp - H))).astype(dtype)
    lab = jnp.pad(labels.astype(jnp.int32), (0, Bp - B)).reshape(Bp, 1)

    nb, nl, nk = Bp // tm, Lp // tn, Hp // tk
    itemsize = dtype.itemsize
    mask_pad = (Lp != num_labels)

    kernel = functools.partial(_fused_kernel, num_labels=num_labels, tn=tn,
                               mask_pad=mask_pad)

    logits_p, nll_p = pl.pallas_call(
        kernel,
        out_shape=(
            jax.ShapeDtypeStruct((Bp, Lp), jnp.float32),
            jax.ShapeDtypeStruct((Bp, 1), jnp.float32),
        ),
        grid_spec=pltpu.PrefetchScalarGridSpec(
            num_scalar_prefetch=0,
            grid=(nb, nl, nk),
            in_specs=[
                pl.BlockSpec((tm, 1), lambda bi, li, ki: (bi, 0)),    # labels
                pl.BlockSpec((tm, tk), lambda bi, li, ki: (bi, ki)),  # hidden
                # If profiling shows the weight DMA exposed, add
                # pipeline_mode=pl.Buffered(3) here.
                pl.BlockSpec((tk, tn), lambda bi, li, ki: (ki, li)),  # weight
            ],
            out_specs=[
                pl.BlockSpec((tm, tn), lambda bi, li, ki: (bi, li)),  # logits
                pl.BlockSpec((tm, 1), lambda bi, li, ki: (bi, 0)),    # per-ex NLL
            ],
            scratch_shapes=[
                pltpu.VMEM((tm, 1), jnp.float32),    # running max
                pltpu.VMEM((tm, 1), jnp.float32),    # running sum(exp)
                pltpu.VMEM((tm, 1), jnp.float32),    # picked logit
            ],
        ),
        compiler_params=_compiler_params(vmem_limit),
        cost_estimate=pl.CostEstimate(
            flops=2 * Bp * Hp * Lp,
            transcendentals=Bp * Lp,
            bytes_accessed=(Bp * Hp * nl + Hp * Lp * nb) * itemsize
                           + Bp * Lp * 4 + Bp * 8,
        ),
    )(lab, h, weight_p)

    logits = logits_p[:B, :num_labels]
    nll = nll_p[:B, 0]

    # CrossEntropyLoss default ignore_index=-100: exclude negative labels
    # from the mean.
    valid = labels >= 0
    count = jnp.maximum(jnp.sum(valid.astype(jnp.float32)), 1.0)
    loss = jnp.sum(jnp.where(valid, nll, 0.0)) / count
    return loss, logits


# ----------------------------------------------------------------------------
# Kernel 2: plain tiled matmul for the labels=None path
# ----------------------------------------------------------------------------
def _matmul_kernel(h_ref, w_ref, o_ref):
    # o_ref is f32 and its block index is constant across ki -> accumulate
    # directly into it (no separate scratch accumulator).
    @pl.when(pl.program_id(2) == 0)
    def _():
        o_ref[...] = jnp.zeros_like(o_ref)

    o_ref[...] += jnp.dot(h_ref[...], w_ref[...],
                          preferred_element_type=jnp.float32)


@functools.partial(
    jax.jit,
    static_argnames=("num_labels", "tm", "tk", "tn", "compute_dtype_name",
                     "vmem_limit"))
def _forward_logits(hidden, weight_p, *, num_labels, tm, tk, tn,
                    compute_dtype_name, vmem_limit):
    B, H = hidden.shape
    Hp, Lp = weight_p.shape
    dtype = jnp.dtype(compute_dtype_name)

    Bp = _round_up(B, tm)
    h = jnp.pad(hidden, ((0, Bp - B), (0, Hp - H))).astype(dtype)

    nb, nl, nk = Bp // tm, Lp // tn, Hp // tk
    itemsize = dtype.itemsize

    logits_p = pl.pallas_call(
        _matmul_kernel,
        out_shape=jax.ShapeDtypeStruct((Bp, Lp), jnp.float32),
        grid_spec=pltpu.PrefetchScalarGridSpec(
            num_scalar_prefetch=0,
            grid=(nb, nl, nk),
            in_specs=[
                pl.BlockSpec((tm, tk), lambda bi, li, ki: (bi, ki)),
                pl.BlockSpec((tk, tn), lambda bi, li, ki: (ki, li)),
            ],
            out_specs=pl.BlockSpec((tm, tn), lambda bi, li, ki: (bi, li)),
            scratch_shapes=[],
        ),
        compiler_params=_compiler_params(vmem_limit),
        cost_estimate=pl.CostEstimate(
            flops=2 * Bp * Hp * Lp,
            transcendentals=0,
            bytes_accessed=(Bp * Hp * nl + Hp * Lp * nb) * itemsize
                           + Bp * Lp * 4,
        ),
    )(h, weight_p)

    return logits_p[:B, :num_labels]


# ----------------------------------------------------------------------------
# Module-equivalent wrapper
# ----------------------------------------------------------------------------
class ClassifierPallas:
    """JAX/Pallas equivalent of the PyTorch Classifier module."""

    def __init__(self, hidden_dim, label_num, key, prev_classifier=None,
                 compute_dtype=jnp.bfloat16):
        # xavier_normal_: std = sqrt(2 / (fan_in + fan_out)).
        std = (2.0 / (hidden_dim + label_num)) ** 0.5
        w = std * jax.random.normal(key, (hidden_dim, label_num),
                                    dtype=jnp.float32)
        if prev_classifier is not None:
            # mimic: classifier_weight = cat((prev.classifier_weight, w), dim=-1)
            w = jnp.concatenate([prev_classifier.classifier_weight, w], axis=-1)

        self.classifier_weight = w            # master copy (f32, unpadded)
        self.hidden_dim = int(w.shape[0])
        self.label_num = int(w.shape[1])
        # bf16 compute (f32 accumulate) by default; pass jnp.float32 for
        # bit-faithful f32 matmul numerics.
        self.compute_dtype = jnp.dtype(compute_dtype)

        itemsize = self.compute_dtype.itemsize
        if itemsize <= 2:
            self._tm_cap, tk_cap, tn_cap = 512, 2048, 1024
        else:
            self._tm_cap, tk_cap, tn_cap = 512, 1024, 1024
        self._tk = _balanced_tile(self.hidden_dim, tk_cap, 128)
        self._tn = _balanced_tile(self.label_num, tn_cap, 128)

        Hp = _round_up(self.hidden_dim, self._tk)
        Lp = _round_up(self.label_num, self._tn)
        # Pre-pad + pre-cast the static weight ONCE (avoids an extra HBM
        # read+write of the H x L matrix on every forward call).
        self._weight_padded = jnp.pad(
            w, ((0, Hp - self.hidden_dim), (0, Lp - self.label_num))
        ).astype(self.compute_dtype)

        self._vmem_limit = _vmem_limit_bytes()

    def __call__(self, hidden, labels=None):
        assert hidden.shape[-1] == self.hidden_dim
        tm = _balanced_tile(hidden.shape[0], self._tm_cap, 8)
        common = dict(num_labels=self.label_num, tm=tm, tk=self._tk,
                      tn=self._tn, compute_dtype_name=self.compute_dtype.name,
                      vmem_limit=self._vmem_limit)
        if labels is not None:
            loss, logits = _forward_with_loss(
                hidden, self._weight_padded, labels, **common)
            return (loss, logits)
        return (_forward_logits(hidden, self._weight_padded, **common),)


# ----------------------------------------------------------------------------
# Demo / smoke test
# ----------------------------------------------------------------------------
if __name__ == "__main__":
    key = jax.random.PRNGKey(0)
    k_w, k_h, k_l = jax.random.split(key, 3)

    B, H, L = 8, 32, 16   # small shapes: batch=8, hidden=32, label_num=16

    clf = ClassifierPallas(hidden_dim=H, label_num=L, key=k_w)

    hidden = jax.random.normal(k_h, (B, H), dtype=jnp.float32)
    labels = jax.random.randint(k_l, (B,), 0, L, dtype=jnp.int32)

    # forward without labels -> (logits,)
    (logits_only,) = clf(hidden)
    jax.block_until_ready(logits_only)

    # forward with labels -> (loss, logits)
    loss, logits = clf(hidden, labels)
    jax.block_until_ready((loss, logits))

    # sanity check against a pure-JAX reference using the same bf16 inputs
    # (kernel computes bf16 x bf16 with f32 accumulation).
    h_c = hidden.astype(clf.compute_dtype)
    w_c = clf.classifier_weight.astype(clf.compute_dtype)
    ref_logits = jnp.dot(h_c, w_c, preferred_element_type=jnp.float32)
    ref_lse = jax.nn.logsumexp(ref_logits, axis=-1)
    ref_nll = ref_lse - ref_logits[jnp.arange(B), labels]
    ref_loss = jnp.mean(ref_nll)

    assert jnp.allclose(logits_only, ref_logits, atol=1e-3, rtol=1e-3)
    assert jnp.allclose(logits, ref_logits, atol=1e-3, rtol=1e-3)
    assert jnp.allclose(loss, ref_loss, atol=1e-3, rtol=1e-3)

    # ignore_index=-100 handling (label 0 ignored from the mean)
    labels_ign = labels.at[0].set(-100)
    loss_ign, _ = clf(hidden, labels_ign)
    jax.block_until_ready(loss_ign)
    valid = labels_ign >= 0
    ref_loss_ign = (jnp.sum(jnp.where(valid, ref_lse - ref_logits[
        jnp.arange(B), jnp.maximum(labels_ign, 0)], 0.0))
        / jnp.sum(valid.astype(jnp.float32)))
    assert jnp.allclose(loss_ign, ref_loss_ign, atol=1e-3, rtol=1e-3)

    print("KERNEL_OK")
</pallas_src>

<mosaic_0001>
module attributes {stable_mosaic.version = 11 : i64} {
  func.func @_matmul_kernel(%arg0: i32, %arg1: i32, %arg2: i32, %arg3: memref<8x128xbf16, #tpu.memory_space<vmem>>, %arg4: memref<128x128xbf16, #tpu.memory_space<vmem>>, %arg5: memref<8x128xf32, #tpu.memory_space<vmem>>) attributes {dimension_semantics = [#tpu.dimension_semantics<parallel>, #tpu.dimension_semantics<arbitrary>, #tpu.dimension_semantics<arbitrary>], iteration_bounds = array<i64: 1, 1, 1>, scalar_prefetch = 0 : i64, scratch_operands = 0 : i64, tpu.core_type = #tpu.core_type<tc>, window_params = [{transform_indices = @transform_0, window_bounds = array<i64: 8, 128>}, {transform_indices = @transform_1, window_bounds = array<i64: 128, 128>}, {transform_indices = @transform_2, window_bounds = array<i64: 8, 128>}]} {
    %c0_i32 = arith.constant 0 : i32
    %0 = arith.cmpi eq, %arg2, %c0_i32 : i32
    %1 = arith.extui %0 : i1 to i32
    %c0_i32_0 = arith.constant 0 : i32
    %2 = arith.cmpi ne, %1, %c0_i32_0 : i32
    scf.if %2 {
      %cst_8 = arith.constant 0.000000e+00 : f32
      %9 = vector.broadcast %cst_8 : f32 to vector<8x128xf32>
      %c0_9 = arith.constant 0 : index
      %c0_10 = arith.constant 0 : index
      %10 = vector.load %arg5[%c0_9, %c0_10] : memref<8x128xf32, #tpu.memory_space<vmem>>, vector<8x128xf32>
      tpu.vector_store %arg5[%c0_9, %c0_10], %9 {strides = array<i32>} : memref<8x128xf32, #tpu.memory_space<vmem>>, vector<8x128xf32>,
    } else {
    }
    %c0 = arith.constant 0 : index
    %c0_1 = arith.constant 0 : index
    %3 = vector.load %arg5[%c0, %c0_1] : memref<8x128xf32, #tpu.memory_space<vmem>>, vector<8x128xf32>
    %c0_2 = arith.constant 0 : index
    %c0_3 = arith.constant 0 : index
    %4 = vector.load %arg3[%c0_2, %c0_3] : memref<8x128xbf16, #tpu.memory_space<vmem>>, vector<8x128xbf16>
    %c0_4 = arith.constant 0 : index
    %c0_5 = arith.constant 0 : index
    %5 = vector.load %arg4[%c0_4, %c0_5] : memref<128x128xbf16, #tpu.memory_space<vmem>>, vector<128x128xbf16>
    %cst = arith.constant dense<0.000000e+00> : vector<8x128xf32>
    %6 = tpu.matmul %4, %5, %cst {dimension_numbers = #tpu.dot_dimension_numbers<[1], [0], [0], [1], [0, 0, 1, 1], [], []>} : vector<8x128xbf16>, vector<128x128xbf16>, vector<8x128xf32> -> vector<8x128xf32>
    %7 = arith.addf %3, %6 : vector<8x128xf32>
    %c0_6 = arith.constant 0 : index
    %c0_7 = arith.constant 0 : index
    %8 = vector.load %arg5[%c0_6, %c0_7] : memref<8x128xf32, #tpu.memory_space<vmem>>, vector<8x128xf32>
    tpu.vector_store %arg5[%c0_6, %c0_7], %7 {strides = array<i32>} : memref<8x128xf32, #tpu.memory_space<vmem>>, vector<8x128xf32>,
    return
  }
  func.func @transform_0(%arg0: i32, %arg1: i32, %arg2: i32) -> (i32, i32) {
    %c0_i32 = arith.constant 0 : i32
    return %arg0, %arg2 : i32, i32
  }
  func.func @transform_1(%arg0: i32, %arg1: i32, %arg2: i32) -> (i32, i32) {
    %c0_i32 = arith.constant 0 : i32
    return %arg2, %arg1 : i32, i32
  }
  func.func @transform_2(%arg0: i32, %arg1: i32, %arg2: i32) -> (i32, i32) {
    %c0_i32 = arith.constant 0 : i32
    return %arg0, %arg1 : i32, i32
  }
}

</mosaic_0001>

<bundles_post_ra>
// kernel: _forward_logits.1
= control target key start
LH: loop header
LB: loop body
LE: loop exit
PB: predicated region body
PF: predicated region fallthrough
CT: control target
= control target key end

     0   :  { %7 = vsyncpa [#allocation3], 0  ;;  %s302_s0 = inlined_call_operand.vmem [shape: bf16[8,128], index: 0, kind: input, shape index: {}]   ;;  %s303_s1 = inlined_call_operand.hbm [shape: bf16[128,128], index: 1, kind: input, shape index: {}]   ;;  %s304_s2 = inlined_call_operand.hbm [shape: f32[8,128], index: 2, kind: output, shape index: {}]  }
   0x1   :  { %8 = vsyncpa [#allocation4], 0  ;;  %s254_s9 = smov [#allocation2]   ;;  %s206_s13 = scalar_lea.hbm %s303_s1, 1024 }
   0x2   :  { %s16_s10 = sshll.u32 %s254_s9, 4  ;;  %p207_p0 = scmp.ne.s32.totalorder %s303_s1, %s206_s13  ;;  %s17_s10 = int_to_ptr.vmem [resolvable:$true] %s16_s10 }
   0x3   :  { %p210_p1 = scmp.lt.u32.totalorder %s206_s13, %s303_s1 }
   0x5   :  { %p212_p2 = pnand %p210_p1, %p207_p0 }
   0x7   :  { %215 = shalt.err (!%p212_p2)
}
   0x8   :  { %s216_s18 = scalar_lea.vmem %s17_s10, 1024  ;;  %p221_p4 = scmp.lt.s32.totalorder %s17_s10, %s17_s10 }
   0x9   :  { %p217_p3 = scmp.ne.s32.totalorder %s17_s10, %s216_s18  ;;  %p222_p5 = scmp.lt.s32.totalorder %s216_s18, %s216_s18 }
   0xb   :  { %p223_p6 = por %p222_p5, %p221_p4 }
   0xd   :  { %p224_p7 = pnand %p223_p6, %p217_p3 }
   0xf   :  { %227 = shalt.err (!%p224_p7)
}
  0x10   :  { %s255_s19 = smov 64   ;;  %s256_s20 = smov 4  }
  0x11   :  { %22 = dma.hbm_to_vmem [thread:$0]  %s303_s1, 1024, %s17_s10, [#allocation3], %s255_s19, %s255_s19, %s256_s20  }
  0x12   :  { %250 = dma.done.wait [#allocation3], 1024  }
  0x13   :  { %251 = vsyncadd [#allocation3], 4294966272  ;;  %v257_v0 = vmov 0.0   ;;  %vm258_vm0 = vmmov 0   ;;  %v198_v1 = vld [vmem:[#allocation2] sm:$0xff]   ;;  %v199_v2 = vld [vmem:[#allocation2 + $0x8] sm:$0xff]  }
  0x14   :  { %172 = vmatprep.subr.bf16.mxu0 %v257_v0  ;;  %188 = vmatprep.mubr.msk.bf16.mxu0 %vm258_vm0, %v257_v0  ;;  %v200_v3 = vld [vmem:[#allocation2 + $0x10] sm:$0xff]   ;;  %v201_v4 = vld [vmem:[#allocation2 + $0x18] sm:$0xff]   ;;  %v202_v5 = vld [vmem:[#allocation2 + $0x20] sm:$0xff]   ;;  %s259_s24 = smov [#allocation5]  }
  0x15   :  { %173 = vmatpush3.bf16.msra.mxu0 %v198_v1  ;;  %v203_v6 = vld [vmem:[#allocation2 + $0x28] sm:$0xff]   ;;  %v204_v7 = vld [vmem:[#allocation2 + $0x30] sm:$0xff]   ;;  %v205_v8 = vld [vmem:[#allocation2 + $0x38] sm:$0xff]   ;;  %s146_s25 = sshll.u32 %s259_s24, 4  ;;  %s147_s25 = int_to_ptr.vmem [resolvable:$true] %s146_s25 }
  0x16   :  { %174 = vmatprep.subr.bf16.mxu0 %v257_v0  ;;  %v33_v9 = vld [vmem:[%s302_s0] sm:$0xf]  ;;  %s228_s26 = scalar_lea.vmem %s147_s25, 128  ;;  %p233_p9 = scmp.lt.s32.totalorder %s147_s25, %s147_s25 }
  0x17   :  { %p229_p8 = scmp.ne.s32.totalorder %s147_s25, %s228_s26  ;;  %p234_p10 = scmp.lt.s32.totalorder %s228_s26, %s228_s26 }
  0x19   :  { %175 = vmatpush3.bf16.msra.mxu0 %v199_v2  ;;  %p235_p11 = por %p234_p10, %p233_p9 }
  0x1a   :  { %176 = vmatprep.subr.bf16.mxu0 %v257_v0 }
  0x1b   :  { %p236_p12 = pnand %p235_p11, %p229_p8 }
  0x1d   :  { %177 = vmatpush3.bf16.msra.mxu0 %v200_v3 }
  0x1e   :  { %178 = vmatprep.subr.bf16.mxu0 %v257_v0 }
  0x21   :  { %179 = vmatpush3.bf16.msra.mxu0 %v201_v4 }
  0x22   :  { %180 = vmatprep.subr.bf16.mxu0 %v257_v0 }
  0x25   :  { %181 = vmatpush3.bf16.msra.mxu0 %v202_v5 }
  0x26   :  { %182 = vmatprep.subr.bf16.mxu0 %v257_v0 }
  0x29   :  { %183 = vmatpush3.bf16.msra.mxu0 %v203_v6 }
  0x2a   :  { %184 = vmatprep.subr.bf16.mxu0 %v257_v0 }
  0x2d   :  { %185 = vmatpush3.bf16.msra.mxu0 %v204_v7 }
  0x2e   :  { %186 = vmatprep.subr.bf16.mxu0 %v257_v0 }
  0x31   :  { %187 = vmatpush3.bf16.msra.mxu0 %v205_v8 }
  0x34   :  { %189 = vmatmul.mubr.bf16.vlgmr.msra.gmra.mrb[0].mxu0 %v33_v9 }
 0x107   :  { %v132_v10 = vpop.f32.mrb[0].mxu0 }
 0x108   :  { %v190_v11 = vpop.f32.mrb[1].mxu0  ;;  %139 = vst [vmem:[#allocation5] sm:$0xff] %v132_v10 }
 0x109   :  { %v135_v12 = vpop.f32.mrb[2].mxu0 }
 0x10a   :  { %v191_v13 = vpop.f32.mrb[3].mxu0 }
 0x10b   :  { %239 = shalt.err (!%p236_p12)
}
 0x10c   :  { %s240_s0 = scalar_lea.hbm %s304_s2, 128 }
 0x10d   :  { %p241_p13 = scmp.ne.s32.totalorder %s304_s2, %s240_s0  ;;  %p244_p0 = scmp.lt.u32.totalorder %s240_s0, %s304_s2 }
 0x10f   :  { %p246_p1 = pnand %p244_p0, %p241_p13 }
 0x111   :  { %249 = shalt.err (!%p246_p1)
}
 0x112   :  { %149 = dma.vmem_to_hbm [thread:$0]  %s147_s25, 128, %s304_s2, [#allocation4]  }
 0x113   :  { %252 = dma.done.wait [#allocation4], 128  }
 0x114   :  { %253 = vsyncadd [#allocation4], 4294967168 }
 0x115   :  { %153 = vsyncpa [#allocation3], 1 }
 0x116   :  { %154 = vsyncpa [#allocation4], 1 }

</bundles_post_ra>
